<compile_context>
chip_gen: v6e
topology: v6e:2x2x1
jax: 0.10.0
libtpu: 0.0.40
codegen_flags: <defaults>
</compile_context>

<pallas_src>
import functools

import jax
import jax.numpy as jnp
from jax.experimental import pallas as pl
from jax.experimental.pallas import tpu as pltpu


def _round_up(a: int, m: int) -> int:
    return ((a + m - 1) // m) * m


def mlp_kernel(x_ref, w1_ref, b1_ref, w2_ref, b2_ref, o_ref):
    # Cast x to the matmul dtype on the VPU (free under the DMA bottleneck);
    # the wrapper no longer pre-casts x, so its HBM->VMEM DMA is native dtype.
    x = x_ref[...].astype(w1_ref.dtype)
    # First (folded) linear: [TBf, F*D_in] @ [F*D_in, F*H] -> [TBf, F*H], f32 acc.
    h = jnp.dot(x, w1_ref[...], preferred_element_type=jnp.float32)
    # Bias + ReLU in f32 on the VPU (b1 is [1, F*H], broadcasts over rows).
    h = jnp.maximum(h + b1_ref[...], 0.0)
    # Second (folded) linear: cast the activation to the weight dtype, f32 acc.
    y = jnp.dot(h.astype(w2_ref.dtype), w2_ref[...],
                preferred_element_type=jnp.float32)
    y = y + b2_ref[...]                      # b2 is [1, F*D_out], f32
    o_ref[...] = y.astype(o_ref.dtype)       # lane-dense (128-wide) store


@functools.partial(jax.jit, static_argnames=("block_b", "matmul_dtype"))
def net_forward(x, w1, b1, w2, b2, *, block_b: int = 4096, matmul_dtype=jnp.bfloat16):
    """Forward pass of Net.

    x:  [B, D_in]   (any float dtype; output has the same dtype)
    w1: [D_in, H]    b1: [H] or [1, H]
    w2: [H, D_out]   b2: [D_out] or [1, D_out]
    block_b:      batch tile size in original rows (rounded to the fold/sublane alignment).
    matmul_dtype: dtype for MXU operands (None -> keep native dtype, e.g. pure f32).
    """
    B, D_in = x.shape
    H = w1.shape[1]
    D_out = w2.shape[1]
    out_dtype = x.dtype

    b1 = b1.reshape(1, H)
    b2 = b2.reshape(1, D_out)

    # ---- lane-dense fold factor: fold consecutive batch rows into lanes ----
    if D_out < 128 and 128 % D_out == 0:
        fold = min(128 // D_out, 8)   # cap flop inflation from block-diag weights
    else:
        fold = 1
    align = 8 * fold                  # keeps folded sublane dim a multiple of 8

    # Pad the batch only to a small alignment (decoupled from the tile size).
    B_pad = _round_up(B, align)
    if B_pad != B:
        x = jnp.pad(x, ((0, B_pad - B), (0, 0)))

    # Batch tile in original rows; grid handles a partial last block via cdiv.
    TB = min(_round_up(block_b, align), B_pad)
    grid = (pl.cdiv(B_pad, TB),)

    # ---- fold (free row-major reshape in HBM) + block-diagonal weights ----
    md = matmul_dtype if matmul_dtype is not None else w1.dtype
    xf = x.reshape(B_pad // fold, fold * D_in)            # NOT cast: native dtype DMA
    eye = jnp.eye(fold, dtype=md)
    w1f = jnp.kron(eye, w1.astype(md))                    # [F*D_in, F*H] block-diag
    w2f = jnp.kron(eye, w2.astype(md))                    # [F*H, F*D_out] block-diag
    b1f = jnp.tile(b1.astype(jnp.float32), (1, fold))     # [1, F*H]
    b2f = jnp.tile(b2.astype(jnp.float32), (1, fold))     # [1, F*D_out]

    Bf = B_pad // fold
    TBf = TB // fold

    flops = 2 * B_pad * fold * (D_in * H + H * D_out)     # includes block-diag zero work
    bytes_accessed = int(
        B_pad * D_in * x.dtype.itemsize                   # x in its NATIVE dtype
        + w1f.size * w1f.dtype.itemsize
        + w2f.size * w2f.dtype.itemsize
        + b1f.size * b1f.dtype.itemsize
        + b2f.size * b2f.dtype.itemsize
        + B_pad * D_out * jnp.dtype(out_dtype).itemsize
    )

    out_f = pl.pallas_call(
        mlp_kernel,
        out_shape=jax.ShapeDtypeStruct((Bf, fold * D_out), out_dtype),
        grid_spec=pltpu.PrefetchScalarGridSpec(
            num_scalar_prefetch=0,
            grid=grid,
            in_specs=[
                # x (folded): tiled over batch.
                pl.BlockSpec((TBf, fold * D_in), lambda i: (i, 0)),
                # Weights / biases: constant index_map -> VMEM-resident across grid.
                pl.BlockSpec((fold * D_in, fold * H), lambda i: (0, 0)),
                pl.BlockSpec((1, fold * H), lambda i: (0, 0)),
                pl.BlockSpec((fold * H, fold * D_out), lambda i: (0, 0)),
                pl.BlockSpec((1, fold * D_out), lambda i: (0, 0)),
            ],
            out_specs=pl.BlockSpec((TBf, fold * D_out), lambda i: (i, 0)),
        ),
        compiler_params=pltpu.CompilerParams(
            # Independent batch tiles -> parallel (megacore sharding on v7x).
            dimension_semantics=("parallel",),
        ),
        cost_estimate=pl.CostEstimate(
            flops=flops, transcendentals=0, bytes_accessed=bytes_accessed
        ),
    )(xf, w1f, b1f, w2f, b2f)

    # Un-fold: free row-major reshape, then drop padded rows.
    return out_f.reshape(B_pad, D_out)[:B]


if __name__ == "__main__":
    # Shapes consistent with Net(input_num=32, output_num=16, hidden_num=64).
    batch, input_num, hidden_num, output_num = 24, 32, 64, 16

    key = jax.random.PRNGKey(0)
    kx, kw1, kb1, kw2, kb2, kx2 = jax.random.split(key, 6)

    x = jax.random.normal(kx, (batch, input_num), dtype=jnp.float32)

    # PyTorch-Linear-style init (weights stored transposed: [in, out]).
    bound1 = 1.0 / (input_num ** 0.5)
    w1 = jax.random.uniform(kw1, (input_num, hidden_num), jnp.float32, -bound1, bound1)
    b1 = jax.random.uniform(kb1, (hidden_num,), jnp.float32, -bound1, bound1)
    bound2 = 1.0 / (hidden_num ** 0.5)
    w2 = jax.random.uniform(kw2, (hidden_num, output_num), jnp.float32, -bound2, bound2)
    b2 = jax.random.uniform(kb2, (output_num,), jnp.float32, -bound2, bound2)

    def ref_fn(xv):
        return jnp.maximum(xv @ w1 + b1, 0.0) @ w2 + b2

    # 1) Pure-f32 path (tight tolerance), single batch tile.
    y_f32 = net_forward(x, w1, b1, w2, b2, matmul_dtype=None)
    jax.block_until_ready(y_f32)
    assert y_f32.shape == (batch, output_num)
    assert jnp.allclose(y_f32, ref_fn(x), atol=1e-4, rtol=1e-4)

    # 2) bf16-operand / f32-accumulate path (looser tolerance).
    y_bf16 = net_forward(x, w1, b1, w2, b2, matmul_dtype=jnp.bfloat16)
    jax.block_until_ready(y_bf16)
    assert y_bf16.shape == (batch, output_num)
    assert jnp.allclose(y_bf16, ref_fn(x), atol=5e-2, rtol=5e-2)

    # 3) Multi-tile grid with a partial last block (padding decoupled from tile):
    #    B=200 -> B_pad=256, TB=192 -> grid=(2,), second block partially valid.
    x_big = jax.random.normal(kx2, (200, input_num), dtype=jnp.float32)
    y_big = net_forward(x_big, w1, b1, w2, b2, block_b=192, matmul_dtype=None)
    jax.block_until_ready(y_big)
    assert y_big.shape == (200, output_num)
    assert jnp.allclose(y_big, ref_fn(x_big), atol=1e-4, rtol=1e-4)

    print("KERNEL_OK")
</pallas_src>

<mosaic_0001>
module attributes {stable_mosaic.version = 11 : i64} {
  func.func @mlp_kernel(%arg0: i32, %arg1: memref<8x256xf32, #tpu.memory_space<vmem>>, %arg2: memref<256x512xf32, #tpu.memory_space<vmem>>, %arg3: memref<1x512xf32, #tpu.memory_space<vmem>>, %arg4: memref<512x128xf32, #tpu.memory_space<vmem>>, %arg5: memref<1x128xf32, #tpu.memory_space<vmem>>, %arg6: memref<8x128xf32, #tpu.memory_space<vmem>>) attributes {dimension_semantics = [#tpu.dimension_semantics<parallel>], iteration_bounds = array<i64: 1>, scalar_prefetch = 0 : i64, scratch_operands = 0 : i64, tpu.core_type = #tpu.core_type<tc>, window_params = [{transform_indices = @transform_0, window_bounds = array<i64: 8, 256>}, {pipeline_mode = #tpu.pipeline_mode<synchronous>, transform_indices = @transform_1, window_bounds = array<i64: 256, 512>}, {pipeline_mode = #tpu.pipeline_mode<synchronous>, transform_indices = @transform_2, window_bounds = array<i64: 1, 512>}, {pipeline_mode = #tpu.pipeline_mode<synchronous>, transform_indices = @transform_3, window_bounds = array<i64: 512, 128>}, {pipeline_mode = #tpu.pipeline_mode<synchronous>, transform_indices = @transform_4, window_bounds = array<i64: 1, 128>}, {transform_indices = @transform_5, window_bounds = array<i64: 8, 128>}]} {
    %c0 = arith.constant 0 : index
    %c0_0 = arith.constant 0 : index
    %0 = vector.load %arg1[%c0, %c0_0] : memref<8x256xf32, #tpu.memory_space<vmem>>, vector<8x256xf32>
    %c0_1 = arith.constant 0 : index
    %c0_2 = arith.constant 0 : index
    %1 = vector.load %arg2[%c0_1, %c0_2] : memref<256x512xf32, #tpu.memory_space<vmem>>, vector<256x512xf32>
    %cst = arith.constant dense<0.000000e+00> : vector<8x512xf32>
    %2 = tpu.matmul %0, %1, %cst {dimension_numbers = #tpu.dot_dimension_numbers<[1], [0], [0], [1], [0, 0, 1, 1], [], []>} : vector<8x256xf32>, vector<256x512xf32>, vector<8x512xf32> -> vector<8x512xf32>
    %c0_3 = arith.constant 0 : index
    %c0_4 = arith.constant 0 : index
    %3 = vector.load %arg3[%c0_3, %c0_4] : memref<1x512xf32, #tpu.memory_space<vmem>>, vector<1x512xf32>
    %4 = vector.broadcast %3 : vector<1x512xf32> to vector<8x512xf32>
    %5 = arith.addf %2, %4 : vector<8x512xf32>
    %cst_5 = arith.constant 0.000000e+00 : f32
    %6 = vector.broadcast %cst_5 : f32 to vector<8x512xf32>
    %7 = arith.maximumf %5, %6 : vector<8x512xf32>
    %c0_6 = arith.constant 0 : index
    %c0_7 = arith.constant 0 : index
    %8 = vector.load %arg4[%c0_6, %c0_7] : memref<512x128xf32, #tpu.memory_space<vmem>>, vector<512x128xf32>
    %cst_8 = arith.constant dense<0.000000e+00> : vector<8x128xf32>
    %9 = tpu.matmul %7, %8, %cst_8 {dimension_numbers = #tpu.dot_dimension_numbers<[1], [0], [0], [1], [0, 0, 1, 1], [], []>} : vector<8x512xf32>, vector<512x128xf32>, vector<8x128xf32> -> vector<8x128xf32>
    %c0_9 = arith.constant 0 : index
    %c0_10 = arith.constant 0 : index
    %10 = vector.load %arg5[%c0_9, %c0_10] : memref<1x128xf32, #tpu.memory_space<vmem>>, vector<1x128xf32>
    %11 = vector.broadcast %10 : vector<1x128xf32> to vector<8x128xf32>
    %12 = arith.addf %9, %11 : vector<8x128xf32>
    %c0_11 = arith.constant 0 : index
    %c0_12 = arith.constant 0 : index
    %13 = vector.load %arg6[%c0_11, %c0_12] : memref<8x128xf32, #tpu.memory_space<vmem>>, vector<8x128xf32>
    tpu.vector_store %arg6[%c0_11, %c0_12], %12 {strides = array<i32>} : memref<8x128xf32, #tpu.memory_space<vmem>>, vector<8x128xf32>,
    return
  }
  func.func @transform_0(%arg0: i32) -> (i32, i32) {
    %c0_i32 = arith.constant 0 : i32
    %c0_i32_0 = arith.constant 0 : i32
    return %arg0, %c0_i32 : i32, i32
  }
  func.func @transform_1(%arg0: i32) -> (i32, i32) {
    %c0_i32 = arith.constant 0 : i32
    %c0_i32_0 = arith.constant 0 : i32
    %c0_i32_1 = arith.constant 0 : i32
    return %c0_i32, %c0_i32_0 : i32, i32
  }
  func.func @transform_2(%arg0: i32) -> (i32, i32) {
    %c0_i32 = arith.constant 0 : i32
    %c0_i32_0 = arith.constant 0 : i32
    %c0_i32_1 = arith.constant 0 : i32
    return %c0_i32, %c0_i32_0 : i32, i32
  }
  func.func @transform_3(%arg0: i32) -> (i32, i32) {
    %c0_i32 = arith.constant 0 : i32
    %c0_i32_0 = arith.constant 0 : i32
    %c0_i32_1 = arith.constant 0 : i32
    return %c0_i32, %c0_i32_0 : i32, i32
  }
  func.func @transform_4(%arg0: i32) -> (i32, i32) {
    %c0_i32 = arith.constant 0 : i32
    %c0_i32_0 = arith.constant 0 : i32
    %c0_i32_1 = arith.constant 0 : i32
    return %c0_i32, %c0_i32_0 : i32, i32
  }
  func.func @transform_5(%arg0: i32) -> (i32, i32) {
    %c0_i32 = arith.constant 0 : i32
    %c0_i32_0 = arith.constant 0 : i32
    return %arg0, %c0_i32 : i32, i32
  }
}

</mosaic_0001>

<bundles_post_ra>
// kernel: net_forward.1
= control target key start
LH: loop header
LB: loop body
LE: loop exit
PB: predicated region body
PF: predicated region fallthrough
CT: control target
= control target key end

     0   :  { %s1226_s1 = inlined_call_operand.vmem [shape: f32[256,512], index: 1, kind: input, shape index: {}]   ;;  %s1227_s0 = inlined_call_operand.vmem [shape: f32[8,256], index: 0, kind: input, shape index: {}]   ;;  %s1228_s3 = inlined_call_operand.vmem [shape: f32[512,128], index: 3, kind: input, shape index: {}]   ;;  %s1229_s2 = inlined_call_operand.vmem [shape: f32[1,512], index: 2, kind: input, shape index: {}]   ;;  %s1230_s4 = inlined_call_operand.vmem [shape: f32[1,128], index: 4, kind: input, shape index: {}]   ;;  %s1231_s5 = inlined_call_operand.vmem [shape: f32[8,128], index: 5, kind: output, shape index: {}]  }
   0x1   :  { %v83_v0 = vld [vmem:[%s1226_s1 + $0x1e8] sm:$0xff]  ;;  %v85_v1 = vld [vmem:[%s1226_s1 + $0x1f8] sm:$0xff]  ;;  %v82_v2 = vld [vmem:[%s1226_s1 + $0x1e0] sm:$0xff] }
   0x2   :  { %172 = vmatprep.subr.mxu0 %v83_v0  ;;  %243 = vmatprep.subr.mxu1 %v85_v1  ;;  %v84_v3 = vld [vmem:[%s1226_s1 + $0x1f0] sm:$0xff]  ;;  %v79_v4 = vld [vmem:[%s1226_s1 + $0x1c8] sm:$0xff]  ;;  %v81_v5 = vld [vmem:[%s1226_s1 + $0x1d8] sm:$0xff] }
   0x3   :  { %173 = vmatpush1.msra.mxu0 %v82_v2  ;;  %244 = vmatpush1.msra.mxu1 %v84_v3  ;;  %v78_v6 = vld [vmem:[%s1226_s1 + $0x1c0] sm:$0xff]  ;;  %v80_v7 = vld [vmem:[%s1226_s1 + $0x1d0] sm:$0xff]  ;;  %v75_v8 = vld [vmem:[%s1226_s1 + $0x1a8] sm:$0xff] }
   0x4   :  { %174 = vmatprep.subr.mxu0 %v79_v4  ;;  %245 = vmatprep.subr.mxu1 %v81_v5  ;;  %v77_v9 = vld [vmem:[%s1226_s1 + $0x1b8] sm:$0xff]  ;;  %v74_v10 = vld [vmem:[%s1226_s1 + $0x1a0] sm:$0xff]  ;;  %v76_v11 = vld [vmem:[%s1226_s1 + $0x1b0] sm:$0xff] }
   0x5   :  { %175 = vmatpush1.msra.mxu0 %v78_v6  ;;  %246 = vmatpush1.msra.mxu1 %v80_v7  ;;  %v71_v12 = vld [vmem:[%s1226_s1 + $0x188] sm:$0xff]  ;;  %v73_v13 = vld [vmem:[%s1226_s1 + $0x198] sm:$0xff]  ;;  %v70_v14 = vld [vmem:[%s1226_s1 + $0x180] sm:$0xff] }
   0x6   :  { %176 = vmatprep.subr.mxu0 %v75_v8  ;;  %247 = vmatprep.subr.mxu1 %v77_v9  ;;  %v72_v15 = vld [vmem:[%s1226_s1 + $0x190] sm:$0xff]  ;;  %v67_v16 = vld [vmem:[%s1226_s1 + $0x168] sm:$0xff]  ;;  %v69_v17 = vld [vmem:[%s1226_s1 + $0x178] sm:$0xff] }
   0x7   :  { %177 = vmatpush1.msra.mxu0 %v74_v10  ;;  %248 = vmatpush1.msra.mxu1 %v76_v11  ;;  %v66_v18 = vld [vmem:[%s1226_s1 + $0x160] sm:$0xff]  ;;  %v68_v19 = vld [vmem:[%s1226_s1 + $0x170] sm:$0xff]  ;;  %v63_v20 = vld [vmem:[%s1226_s1 + $0x148] sm:$0xff] }
   0x8   :  { %178 = vmatprep.subr.mxu0 %v71_v12  ;;  %249 = vmatprep.subr.mxu1 %v73_v13  ;;  %v65_v21 = vld [vmem:[%s1226_s1 + $0x158] sm:$0xff]  ;;  %v62_v22 = vld [vmem:[%s1226_s1 + $0x140] sm:$0xff]  ;;  %v64_v23 = vld [vmem:[%s1226_s1 + $0x150] sm:$0xff] }
   0x9   :  { %179 = vmatpush1.msra.mxu0 %v70_v14  ;;  %250 = vmatpush1.msra.mxu1 %v72_v15  ;;  %v59_v24 = vld [vmem:[%s1226_s1 + $0x128] sm:$0xff]  ;;  %v61_v25 = vld [vmem:[%s1226_s1 + $0x138] sm:$0xff]  ;;  %v58_v26 = vld [vmem:[%s1226_s1 + $0x120] sm:$0xff] }
   0xa   :  { %180 = vmatprep.subr.mxu0 %v67_v16  ;;  %251 = vmatprep.subr.mxu1 %v69_v17  ;;  %v60_v27 = vld [vmem:[%s1226_s1 + $0x130] sm:$0xff]  ;;  %v55_v28 = vld [vmem:[%s1226_s1 + $0x108] sm:$0xff]  ;;  %v57_v29 = vld [vmem:[%s1226_s1 + $0x118] sm:$0xff] }
   0xb   :  { %181 = vmatpush1.msra.mxu0 %v66_v18  ;;  %252 = vmatpush1.msra.mxu1 %v68_v19  ;;  %v54_v30 = vld [vmem:[%s1226_s1 + $0x100] sm:$0xff]  ;;  %v56_v31 = vld [vmem:[%s1226_s1 + $0x110] sm:$0xff]  ;;  %v51_v32 = vld [vmem:[%s1226_s1 + $0xe8] sm:$0xff] }
   0xc   :  { %182 = vmatprep.subr.mxu0 %v63_v20  ;;  %253 = vmatprep.subr.mxu1 %v65_v21  ;;  %v53_v33 = vld [vmem:[%s1226_s1 + $0xf8] sm:$0xff]  ;;  %v50_v34 = vld [vmem:[%s1226_s1 + $0xe0] sm:$0xff]  ;;  %v52_v35 = vld [vmem:[%s1226_s1 + $0xf0] sm:$0xff] }
   0xd   :  { %183 = vmatpush1.msra.mxu0 %v62_v22  ;;  %254 = vmatpush1.msra.mxu1 %v64_v23  ;;  %v47_v36 = vld [vmem:[%s1226_s1 + $0xc8] sm:$0xff]  ;;  %v49_v37 = vld [vmem:[%s1226_s1 + $0xd8] sm:$0xff]  ;;  %v46_v38 = vld [vmem:[%s1226_s1 + $0xc0] sm:$0xff] }
   0xe   :  { %184 = vmatprep.subr.mxu0 %v59_v24  ;;  %255 = vmatprep.subr.mxu1 %v61_v25  ;;  %v48_v39 = vld [vmem:[%s1226_s1 + $0xd0] sm:$0xff]  ;;  %v43_v40 = vld [vmem:[%s1226_s1 + $0xa8] sm:$0xff]  ;;  %v45_v41 = vld [vmem:[%s1226_s1 + $0xb8] sm:$0xff] }
   0xf   :  { %185 = vmatpush1.msra.mxu0 %v58_v26  ;;  %256 = vmatpush1.msra.mxu1 %v60_v27  ;;  %v42_v42 = vld [vmem:[%s1226_s1 + $0xa0] sm:$0xff]  ;;  %v44_v43 = vld [vmem:[%s1226_s1 + $0xb0] sm:$0xff]  ;;  %v39_v44 = vld [vmem:[%s1226_s1 + $0x88] sm:$0xff] }
  0x10   :  { %186 = vmatprep.subr.mxu0 %v55_v28  ;;  %257 = vmatprep.subr.mxu1 %v57_v29  ;;  %v41_v45 = vld [vmem:[%s1226_s1 + $0x98] sm:$0xff]  ;;  %v38_v46 = vld [vmem:[%s1226_s1 + $0x80] sm:$0xff]  ;;  %v40_v47 = vld [vmem:[%s1226_s1 + $0x90] sm:$0xff] }
  0x11   :  { %187 = vmatpush1.msra.mxu0 %v54_v30  ;;  %258 = vmatpush1.msra.mxu1 %v56_v31  ;;  %v35_v48 = vld [vmem:[%s1226_s1 + $0x68] sm:$0xff]  ;;  %v37_v49 = vld [vmem:[%s1226_s1 + $0x78] sm:$0xff]  ;;  %v34_v50 = vld [vmem:[%s1226_s1 + $0x60] sm:$0xff] }
  0x12   :  { %188 = vmatprep.subr.mxu0 %v51_v32  ;;  %259 = vmatprep.subr.mxu1 %v53_v33  ;;  %v36_v51 = vld [vmem:[%s1226_s1 + $0x70] sm:$0xff]  ;;  %v31_v52 = vld [vmem:[%s1226_s1 + $0x48] sm:$0xff]  ;;  %v33_v53 = vld [vmem:[%s1226_s1 + $0x58] sm:$0xff] }
  0x13   :  { %189 = vmatpush1.msra.mxu0 %v50_v34  ;;  %260 = vmatpush1.msra.mxu1 %v52_v35  ;;  %v30_v54 = vld [vmem:[%s1226_s1 + $0x40] sm:$0xff]  ;;  %v32_v55 = vld [vmem:[%s1226_s1 + $0x50] sm:$0xff]  ;;  %v27_v56 = vld [vmem:[%s1226_s1 + $0x28] sm:$0xff] }
  0x14   :  { %190 = vmatprep.subr.mxu0 %v47_v36  ;;  %261 = vmatprep.subr.mxu1 %v49_v37  ;;  %v29_v57 = vld [vmem:[%s1226_s1 + $0x38] sm:$0xff]  ;;  %v26_v58 = vld [vmem:[%s1226_s1 + $0x20] sm:$0xff]  ;;  %v28_v59 = vld [vmem:[%s1226_s1 + $0x30] sm:$0xff] }
  0x15   :  { %191 = vmatpush1.msra.mxu0 %v46_v38  ;;  %262 = vmatpush1.msra.mxu1 %v48_v39  ;;  %v23_v60 = vld [vmem:[%s1226_s1 + $0x8] sm:$0xff]  ;;  %v25_v61 = vld [vmem:[%s1226_s1 + $0x18] sm:$0xff]  ;;  %v22_v62 = vld [vmem:[%s1226_s1] sm:$0xff] }
  0x16   :  { %192 = vmatprep.subr.mxu0 %v43_v40  ;;  %263 = vmatprep.subr.mxu1 %v45_v41  ;;  %v24_v63 = vld [vmem:[%s1226_s1 + $0x10] sm:$0xff]  ;;  %v147_v0 = vld [vmem:[%s1226_s1 + $0x3e8] sm:$0xff]  ;;  %v149_v1 = vld [vmem:[%s1226_s1 + $0x3f8] sm:$0xff] }
  0x17   :  { %193 = vmatpush1.msra.mxu0 %v42_v42  ;;  %264 = vmatpush1.msra.mxu1 %v44_v43  ;;  %v146_v2 = vld [vmem:[%s1226_s1 + $0x3e0] sm:$0xff]  ;;  %v148_v3 = vld [vmem:[%s1226_s1 + $0x3f0] sm:$0xff]  ;;  %v143_v4 = vld [vmem:[%s1226_s1 + $0x3c8] sm:$0xff] }
  0x18   :  { %194 = vmatprep.subr.mxu0 %v39_v44  ;;  %265 = vmatprep.subr.mxu1 %v41_v45  ;;  %v145_v5 = vld [vmem:[%s1226_s1 + $0x3d8] sm:$0xff]  ;;  %v142_v6 = vld [vmem:[%s1226_s1 + $0x3c0] sm:$0xff]  ;;  %v144_v7 = vld [vmem:[%s1226_s1 + $0x3d0] sm:$0xff] }
  0x19   :  { %195 = vmatpush1.msra.mxu0 %v38_v46  ;;  %266 = vmatpush1.msra.mxu1 %v40_v47  ;;  %v139_v8 = vld [vmem:[%s1226_s1 + $0x3a8] sm:$0xff]  ;;  %v141_v9 = vld [vmem:[%s1226_s1 + $0x3b8] sm:$0xff]  ;;  %v138_v10 = vld [vmem:[%s1226_s1 + $0x3a0] sm:$0xff] }
  0x1a   :  { %196 = vmatprep.subr.mxu0 %v35_v48  ;;  %267 = vmatprep.subr.mxu1 %v37_v49  ;;  %v140_v11 = vld [vmem:[%s1226_s1 + $0x3b0] sm:$0xff]  ;;  %v135_v12 = vld [vmem:[%s1226_s1 + $0x388] sm:$0xff]  ;;  %v137_v13 = vld [vmem:[%s1226_s1 + $0x398] sm:$0xff] }
  0x1b   :  { %197 = vmatpush1.msra.mxu0 %v34_v50  ;;  %268 = vmatpush1.msra.mxu1 %v36_v51  ;;  %v134_v14 = vld [vmem:[%s1226_s1 + $0x380] sm:$0xff]  ;;  %v136_v15 = vld [vmem:[%s1226_s1 + $0x390] sm:$0xff]  ;;  %v131_v16 = vld [vmem:[%s1226_s1 + $0x368] sm:$0xff] }
  0x1c   :  { %198 = vmatprep.subr.mxu0 %v31_v52  ;;  %269 = vmatprep.subr.mxu1 %v33_v53  ;;  %v133_v17 = vld [vmem:[%s1226_s1 + $0x378] sm:$0xff]  ;;  %v130_v18 = vld [vmem:[%s1226_s1 + $0x360] sm:$0xff]  ;;  %v132_v19 = vld [vmem:[%s1226_s1 + $0x370] sm:$0xff] }
  0x1d   :  { %199 = vmatpush1.msra.mxu0 %v30_v54  ;;  %270 = vmatpush1.msra.mxu1 %v32_v55  ;;  %v127_v20 = vld [vmem:[%s1226_s1 + $0x348] sm:$0xff]  ;;  %v129_v21 = vld [vmem:[%s1226_s1 + $0x358] sm:$0xff]  ;;  %v126_v22 = vld [vmem:[%s1226_s1 + $0x340] sm:$0xff] }
  0x1e   :  { %200 = vmatprep.subr.mxu0 %v27_v56  ;;  %271 = vmatprep.subr.mxu1 %v29_v57  ;;  %v128_v23 = vld [vmem:[%s1226_s1 + $0x350] sm:$0xff]  ;;  %v123_v24 = vld [vmem:[%s1226_s1 + $0x328] sm:$0xff]  ;;  %v125_v25 = vld [vmem:[%s1226_s1 + $0x338] sm:$0xff] }
  0x1f   :  { %201 = vmatpush1.msra.mxu0 %v26_v58  ;;  %272 = vmatpush1.msra.mxu1 %v28_v59  ;;  %v122_v26 = vld [vmem:[%s1226_s1 + $0x320] sm:$0xff]  ;;  %v124_v27 = vld [vmem:[%s1226_s1 + $0x330] sm:$0xff]  ;;  %v119_v28 = vld [vmem:[%s1226_s1 + $0x308] sm:$0xff] }
  0x20   :  { %202 = vmatprep.subr.mxu0 %v23_v60  ;;  %273 = vmatprep.subr.mxu1 %v25_v61  ;;  %v121_v29 = vld [vmem:[%s1226_s1 + $0x318] sm:$0xff]  ;;  %v118_v30 = vld [vmem:[%s1226_s1 + $0x300] sm:$0xff]  ;;  %v120_v31 = vld [vmem:[%s1226_s1 + $0x310] sm:$0xff] }
  0x21   :  { %203 = vmatpush1.msra.mxu0 %v22_v62  ;;  %274 = vmatpush1.msra.mxu1 %v24_v63  ;;  %v115_v32 = vld [vmem:[%s1226_s1 + $0x2e8] sm:$0xff]  ;;  %v117_v33 = vld [vmem:[%s1226_s1 + $0x2f8] sm:$0xff]  ;;  %v114_v34 = vld [vmem:[%s1226_s1 + $0x2e0] sm:$0xff] }
  0x22   :  { %204 = vmatprep.subr.mxu0 %v147_v0  ;;  %275 = vmatprep.subr.mxu1 %v149_v1  ;;  %v116_v35 = vld [vmem:[%s1226_s1 + $0x2f0] sm:$0xff]  ;;  %v111_v36 = vld [vmem:[%s1226_s1 + $0x2c8] sm:$0xff]  ;;  %v113_v37 = vld [vmem:[%s1226_s1 + $0x2d8] sm:$0xff] }
  0x23   :  { %205 = vmatpush2.msra.mxu0 %v146_v2  ;;  %276 = vmatpush2.msra.mxu1 %v148_v3  ;;  %v110_v38 = vld [vmem:[%s1226_s1 + $0x2c0] sm:$0xff]  ;;  %v112_v39 = vld [vmem:[%s1226_s1 + $0x2d0] sm:$0xff]  ;;  %v107_v40 = vld [vmem:[%s1226_s1 + $0x2a8] sm:$0xff] }
  0x24   :  { %206 = vmatprep.subr.mxu0 %v143_v4  ;;  %277 = vmatprep.subr.mxu1 %v145_v5  ;;  %v109_v41 = vld [vmem:[%s1226_s1 + $0x2b8] sm:$0xff]  ;;  %v106_v42 = vld [vmem:[%s1226_s1 + $0x2a0] sm:$0xff]  ;;  %v108_v43 = vld [vmem:[%s1226_s1 + $0x2b0] sm:$0xff] }
  0x25   :  { %207 = vmatpush2.msra.mxu0 %v142_v6  ;;  %278 = vmatpush2.msra.mxu1 %v144_v7  ;;  %v103_v44 = vld [vmem:[%s1226_s1 + $0x288] sm:$0xff]  ;;  %v105_v45 = vld [vmem:[%s1226_s1 + $0x298] sm:$0xff]  ;;  %v102_v46 = vld [vmem:[%s1226_s1 + $0x280] sm:$0xff] }
  0x26   :  { %208 = vmatprep.subr.mxu0 %v139_v8  ;;  %279 = vmatprep.subr.mxu1 %v141_v9  ;;  %v104_v47 = vld [vmem:[%s1226_s1 + $0x290] sm:$0xff]  ;;  %v99_v48 = vld [vmem:[%s1226_s1 + $0x268] sm:$0xff]  ;;  %v101_v49 = vld [vmem:[%s1226_s1 + $0x278] sm:$0xff] }
  0x27   :  { %209 = vmatpush2.msra.mxu0 %v138_v10  ;;  %280 = vmatpush2.msra.mxu1 %v140_v11  ;;  %v98_v50 = vld [vmem:[%s1226_s1 + $0x260] sm:$0xff]  ;;  %v100_v51 = vld [vmem:[%s1226_s1 + $0x270] sm:$0xff]  ;;  %v95_v52 = vld [vmem:[%s1226_s1 + $0x248] sm:$0xff] }
  0x28   :  { %210 = vmatprep.subr.mxu0 %v135_v12  ;;  %281 = vmatprep.subr.mxu1 %v137_v13  ;;  %v97_v53 = vld [vmem:[%s1226_s1 + $0x258] sm:$0xff]  ;;  %v94_v54 = vld [vmem:[%s1226_s1 + $0x240] sm:$0xff]  ;;  %v96_v55 = vld [vmem:[%s1226_s1 + $0x250] sm:$0xff] }
  0x29   :  { %211 = vmatpush2.msra.mxu0 %v134_v14  ;;  %282 = vmatpush2.msra.mxu1 %v136_v15  ;;  %v91_v56 = vld [vmem:[%s1226_s1 + $0x228] sm:$0xff]  ;;  %v93_v57 = vld [vmem:[%s1226_s1 + $0x238] sm:$0xff]  ;;  %v90_v58 = vld [vmem:[%s1226_s1 + $0x220] sm:$0xff] }
  0x2a   :  { %212 = vmatprep.subr.mxu0 %v131_v16  ;;  %283 = vmatprep.subr.mxu1 %v133_v17  ;;  %v92_v59 = vld [vmem:[%s1226_s1 + $0x230] sm:$0xff]  ;;  %v87_v60 = vld [vmem:[%s1226_s1 + $0x208] sm:$0xff]  ;;  %v89_v61 = vld [vmem:[%s1226_s1 + $0x218] sm:$0xff] }
  0x2b   :  { %213 = vmatpush2.msra.mxu0 %v130_v18  ;;  %284 = vmatpush2.msra.mxu1 %v132_v19  ;;  %v86_v62 = vld [vmem:[%s1226_s1 + $0x200] sm:$0xff]  ;;  %v21_v63 = vld [vmem:[%s1227_s0 + $0x8] sm:$0xff]  ;;  %v88_v0 = vld [vmem:[%s1226_s1 + $0x210] sm:$0xff] }
  0x2c   :  { %214 = vmatprep.subr.mxu0 %v127_v20  ;;  %285 = vmatprep.subr.mxu1 %v129_v21  ;;  %v20_v1 = vld [vmem:[%s1227_s0] sm:$0xff]  ;;  %v349_v2 = vld [vmem:[%s1228_s3 + $0xf8] sm:$0xff]  ;;  %v348_v6 = vld [vmem:[%s1228_s3 + $0xf0] sm:$0xff] }
  0x2d   :  { %215 = vmatpush2.msra.mxu0 %v126_v22  ;;  %286 = vmatpush2.msra.mxu1 %v128_v23  ;;  %v381_v3 = vld [vmem:[%s1228_s3 + $0x1f8] sm:$0xff]  ;;  %v380_v7 = vld [vmem:[%s1228_s3 + $0x1f0] sm:$0xff]  ;;  %v347_v10 = vld [vmem:[%s1228_s3 + $0xe8] sm:$0xff] }
  0x2e   :  { %216 = vmatprep.subr.mxu0 %v123_v24  ;;  %287 = vmatprep.subr.mxu1 %v125_v25  ;;  %v333_v4 = vld [vmem:[%s1228_s3 + $0x78] sm:$0xff]  ;;  %v332_v8 = vld [vmem:[%s1228_s3 + $0x70] sm:$0xff]  ;;  %v379_v11 = vld [vmem:[%s1228_s3 + $0x1e8] sm:$0xff] }
  0x2f   :  { %217 = vmatpush2.msra.mxu0 %v122_v26  ;;  %288 = vmatpush2.msra.mxu1 %v124_v27  ;;  %v365_v5 = vld [vmem:[%s1228_s3 + $0x178] sm:$0xff]  ;;  %v364_v9 = vld [vmem:[%s1228_s3 + $0x170] sm:$0xff]  ;;  %v331_v12 = vld [vmem:[%s1228_s3 + $0x68] sm:$0xff] }
  0x30   :  { %218 = vmatprep.subr.mxu0 %v119_v28  ;;  %289 = vmatprep.subr.mxu1 %v121_v29  ;;  %v363_v13 = vld [vmem:[%s1228_s3 + $0x168] sm:$0xff]  ;;  %v346_v14 = vld [vmem:[%s1228_s3 + $0xe0] sm:$0xff]  ;;  %v345_v18 = vld [vmem:[%s1228_s3 + $0xd8] sm:$0xff] }
  0x31   :  { %219 = vmatpush2.msra.mxu0 %v118_v30  ;;  %290 = vmatpush2.msra.mxu1 %v120_v31  ;;  %v378_v15 = vld [vmem:[%s1228_s3 + $0x1e0] sm:$0xff]  ;;  %v377_v19 = vld [vmem:[%s1228_s3 + $0x1d8] sm:$0xff]  ;;  %v344_v22 = vld [vmem:[%s1228_s3 + $0xd0] sm:$0xff] }
  0x32   :  { %220 = vmatprep.subr.mxu0 %v115_v32  ;;  %291 = vmatprep.subr.mxu1 %v117_v33  ;;  %v330_v16 = vld [vmem:[%s1228_s3 + $0x60] sm:$0xff]  ;;  %v329_v20 = vld [vmem:[%s1228_s3 + $0x58] sm:$0xff]  ;;  %v376_v23 = vld [vmem:[%s1228_s3 + $0x1d0] sm:$0xff] }
  0x33   :  { %221 = vmatpush2.msra.mxu0 %v114_v34  ;;  %292 = vmatpush2.msra.mxu1 %v116_v35  ;;  %v362_v17 = vld [vmem:[%s1228_s3 + $0x160] sm:$0xff]  ;;  %v361_v21 = vld [vmem:[%s1228_s3 + $0x158] sm:$0xff]  ;;  %v328_v24 = vld [vmem:[%s1228_s3 + $0x50] sm:$0xff] }
  0x34   :  { %222 = vmatprep.subr.mxu0 %v111_v36  ;;  %293 = vmatprep.subr.mxu1 %v113_v37  ;;  %v360_v25 = vld [vmem:[%s1228_s3 + $0x150] sm:$0xff]  ;;  %v343_v26 = vld [vmem:[%s1228_s3 + $0xc8] sm:$0xff]  ;;  %v342_v30 = vld [vmem:[%s1228_s3 + $0xc0] sm:$0xff] }
  0x35   :  { %223 = vmatpush2.msra.mxu0 %v110_v38  ;;  %294 = vmatpush2.msra.mxu1 %v112_v39  ;;  %v375_v27 = vld [vmem:[%s1228_s3 + $0x1c8] sm:$0xff]  ;;  %v374_v31 = vld [vmem:[%s1228_s3 + $0x1c0] sm:$0xff]  ;;  %v341_v34 = vld [vmem:[%s1228_s3 + $0xb8] sm:$0xff] }
  0x36   :  { %224 = vmatprep.subr.mxu0 %v107_v40  ;;  %295 = vmatprep.subr.mxu1 %v109_v41  ;;  %v327_v28 = vld [vmem:[%s1228_s3 + $0x48] sm:$0xff]  ;;  %v326_v32 = vld [vmem:[%s1228_s3 + $0x40] sm:$0xff]  ;;  %v373_v35 = vld [vmem:[%s1228_s3 + $0x1b8] sm:$0xff] }
  0x37   :  { %225 = vmatpush2.msra.mxu0 %v106_v42  ;;  %296 = vmatpush2.msra.mxu1 %v108_v43  ;;  %v359_v29 = vld [vmem:[%s1228_s3 + $0x148] sm:$0xff]  ;;  %v358_v33 = vld [vmem:[%s1228_s3 + $0x140] sm:$0xff]  ;;  %v325_v36 = vld [vmem:[%s1228_s3 + $0x38] sm:$0xff] }
  0x38   :  { %226 = vmatprep.subr.mxu0 %v103_v44  ;;  %297 = vmatprep.subr.mxu1 %v105_v45  ;;  %v357_v37 = vld [vmem:[%s1228_s3 + $0x138] sm:$0xff]  ;;  %v340_v38 = vld [vmem:[%s1228_s3 + $0xb0] sm:$0xff]  ;;  %v339_v42 = vld [vmem:[%s1228_s3 + $0xa8] sm:$0xff] }
  0x39   :  { %227 = vmatpush2.msra.mxu0 %v102_v46  ;;  %298 = vmatpush2.msra.mxu1 %v104_v47  ;;  %v372_v39 = vld [vmem:[%s1228_s3 + $0x1b0] sm:$0xff]  ;;  %v371_v43 = vld [vmem:[%s1228_s3 + $0x1a8] sm:$0xff]  ;;  %v338_v46 = vld [vmem:[%s1228_s3 + $0xa0] sm:$0xff] }
  0x3a   :  { %228 = vmatprep.subr.mxu0 %v99_v48  ;;  %299 = vmatprep.subr.mxu1 %v101_v49  ;;  %v324_v40 = vld [vmem:[%s1228_s3 + $0x30] sm:$0xff]  ;;  %v323_v44 = vld [vmem:[%s1228_s3 + $0x28] sm:$0xff]  ;;  %v370_v47 = vld [vmem:[%s1228_s3 + $0x1a0] sm:$0xff] }
  0x3b   :  { %229 = vmatpush2.msra.mxu0 %v98_v50  ;;  %300 = vmatpush2.msra.mxu1 %v100_v51  ;;  %v356_v41 = vld [vmem:[%s1228_s3 + $0x130] sm:$0xff]  ;;  %v355_v45 = vld [vmem:[%s1228_s3 + $0x128] sm:$0xff]  ;;  %v322_v48 = vld [vmem:[%s1228_s3 + $0x20] sm:$0xff] }
  0x3c   :  { %230 = vmatprep.subr.mxu0 %v95_v52  ;;  %301 = vmatprep.subr.mxu1 %v97_v53  ;;  %v354_v49 = vld [vmem:[%s1228_s3 + $0x120] sm:$0xff]  ;;  %v337_v50 = vld [vmem:[%s1228_s3 + $0x98] sm:$0xff] }
  0x3d   :  { %231 = vmatpush2.msra.mxu0 %v94_v54  ;;  %302 = vmatpush2.msra.mxu1 %v96_v55  ;;  %v369_v51 = vld [vmem:[%s1228_s3 + $0x198] sm:$0xff]  ;;  %v336_v54 = vld [vmem:[%s1228_s3 + $0x90] sm:$0xff] }
  0x3e   :  { %232 = vmatprep.subr.mxu0 %v91_v56  ;;  %303 = vmatprep.subr.mxu1 %v93_v57  ;;  %v321_v52 = vld [vmem:[%s1228_s3 + $0x18] sm:$0xff]  ;;  %v368_v55 = vld [vmem:[%s1228_s3 + $0x190] sm:$0xff] }
  0x3f   :  { %233 = vmatpush2.msra.mxu0 %v90_v58  ;;  %304 = vmatpush2.msra.mxu1 %v92_v59  ;;  %v353_v53 = vld [vmem:[%s1228_s3 + $0x118] sm:$0xff]  ;;  %v320_v56 = vld [vmem:[%s1228_s3 + $0x10] sm:$0xff]  ;;  %v335_v58 = vld [vmem:[%s1228_s3 + $0x88] sm:$0xff] }
  0x40   :  { %234 = vmatprep.subr.mxu0 %v87_v60  ;;  %305 = vmatprep.subr.mxu1 %v89_v61  ;;  %v352_v57 = vld [vmem:[%s1228_s3 + $0x110] sm:$0xff]  ;;  %v367_v59 = vld [vmem:[%s1228_s3 + $0x188] sm:$0xff] }
  0x41   :  { %235 = vmatpush2.msra.mxu0 %v86_v62  ;;  %236 = vmatprep.mubr.f32.mxu0 %v21_v63  ;;  %v319_v60 = vld [vmem:[%s1228_s3 + $0x8] sm:$0xff]  ;;  %v334_v62 = vld [vmem:[%s1228_s3 + $0x80] sm:$0xff] }
  0x42   :  { %306 = vmatpush2.msra.mxu1 %v88_v0  ;;  %307 = vmatprep.mubr.f32.mxu1 %v21_v63  ;;  %v351_v61 = vld [vmem:[%s1228_s3 + $0x108] sm:$0xff]  ;;  %v366_v63 = vld [vmem:[%s1228_s3 + $0x180] sm:$0xff] }
  0x43   :  { %237 = vmatmul.mubr.f32.vlgmr.msra.gmra.mxu0 %v20_v1  ;;  %308 = vmatmul.mubr.f32.vlgmr.msra.gmra.mxu1 %v20_v1  ;;  %v318_v0 = vld [vmem:[%s1228_s3] sm:$0xff] }
  0x44   :  { %535 = vmatprep.subr.mxu0 %v349_v2  ;;  %570 = vmatprep.subr.mxu1 %v381_v3  ;;  %v350_v1 = vld [vmem:[%s1228_s3 + $0x100] sm:$0xff]  ;;  %v152_v2 = vlaneseq }
  0x45   :  { %536 = vmatpush3.msra.mxu0 %v333_v4  ;;  %571 = vmatpush3.msra.mxu1 %v365_v5 }
  0x46   :  { %537 = vmatprep.subr.mxu0 %v348_v6  ;;  %572 = vmatprep.subr.mxu1 %v380_v7  ;;  %v153_v3 = vshrl.u32 %v152_v2, 7  ;;  %v150_v6 = vld [vmem:[%s1229_s2] sm:$0xf] }
  0x47   :  { %538 = vmatpush3.msra.mxu0 %v332_v8  ;;  %573 = vmatpush3.msra.mxu1 %v364_v9 }
  0x48   :  { %539 = vmatprep.subr.mxu0 %v347_v10  ;;  %574 = vmatprep.subr.mxu1 %v379_v11  ;;  %v162_v4 = vsub.s32 2, %v153_v3  ;;  %v154_v5 = vsub.s32 0, %v153_v3  ;;  %v158_v7 = vsub.s32 1, %v153_v3  ;;  %v166_v8 = vsub.s32 3, %v153_v3 }
  0x49   :  { %540 = vmatpush3.msra.mxu0 %v331_v12  ;;  %575 = vmatpush3.msra.mxu1 %v363_v13 }
  0x4a   :  { %541 = vmatprep.subr.mxu0 %v346_v14  ;;  %576 = vmatprep.subr.mxu1 %v378_v15  ;;  %v163_v9 = vrot.slane %v150_v6, %v162_v4  ;;  %v155_v10 = vrot.slane %v150_v6, %v154_v5  ;;  %v159_v11 = vrot.slane %v150_v6, %v158_v7 }
  0x4b   :  { %542 = vmatpush3.msra.mxu0 %v330_v16  ;;  %577 = vmatpush3.msra.mxu1 %v362_v17  ;;  %v167_v12 = vrot.slane %v150_v6, %v166_v8 }
  0x4c   :  { %543 = vmatprep.subr.mxu0 %v345_v18  ;;  %578 = vmatprep.subr.mxu1 %v377_v19 }
  0x4d   :  { %544 = vmatpush3.msra.mxu0 %v329_v20  ;;  %579 = vmatpush3.msra.mxu1 %v361_v21 }
  0x4e   :  { %545 = vmatprep.subr.mxu0 %v344_v22  ;;  %580 = vmatprep.subr.mxu1 %v376_v23 }
  0x4f   :  { %546 = vmatpush3.msra.mxu0 %v328_v24  ;;  %581 = vmatpush3.msra.mxu1 %v360_v25 }
  0x50   :  { %547 = vmatprep.subr.mxu0 %v343_v26  ;;  %582 = vmatprep.subr.mxu1 %v375_v27  ;;  %v534_v27 = vld [vmem:[%s1230_s4] ss:$0 sm:$0xff] }
  0x51   :  { %548 = vmatpush3.msra.mxu0 %v327_v28  ;;  %583 = vmatpush3.msra.mxu1 %v359_v29 }
  0x52   :  { %549 = vmatprep.subr.mxu0 %v342_v30  ;;  %584 = vmatprep.subr.mxu1 %v374_v31 }
  0x53   :  { %550 = vmatpush3.msra.mxu0 %v326_v32  ;;  %585 = vmatpush3.msra.mxu1 %v358_v33 }
  0x54   :  { %551 = vmatprep.subr.mxu0 %v341_v34  ;;  %586 = vmatprep.subr.mxu1 %v373_v35 }
  0x55   :  { %552 = vmatpush3.msra.mxu0 %v325_v36  ;;  %587 = vmatpush3.msra.mxu1 %v357_v37 }
  0x56   :  { %553 = vmatprep.subr.mxu0 %v340_v38  ;;  %588 = vmatprep.subr.mxu1 %v372_v39 }
  0x57   :  { %554 = vmatpush3.msra.mxu0 %v324_v40  ;;  %589 = vmatpush3.msra.mxu1 %v356_v41 }
  0x58   :  { %555 = vmatprep.subr.mxu0 %v339_v42  ;;  %590 = vmatprep.subr.mxu1 %v371_v43 }
  0x59   :  { %556 = vmatpush3.msra.mxu0 %v323_v44  ;;  %591 = vmatpush3.msra.mxu1 %v355_v45 }
  0x5a   :  { %557 = vmatprep.subr.mxu0 %v338_v46  ;;  %592 = vmatprep.subr.mxu1 %v370_v47 }
  0x5b   :  { %558 = vmatpush3.msra.mxu0 %v322_v48  ;;  %593 = vmatpush3.msra.mxu1 %v354_v49 }
  0x5c   :  { %559 = vmatprep.subr.mxu0 %v337_v50  ;;  %594 = vmatprep.subr.mxu1 %v369_v51 }
  0x5d   :  { %560 = vmatpush3.msra.mxu0 %v321_v52  ;;  %595 = vmatpush3.msra.mxu1 %v353_v53 }
  0x5e   :  { %561 = vmatprep.subr.mxu0 %v336_v54  ;;  %596 = vmatprep.subr.mxu1 %v368_v55 }
  0x5f   :  { %562 = vmatpush3.msra.mxu0 %v320_v56  ;;  %597 = vmatpush3.msra.mxu1 %v352_v57 }
  0x60   :  { %563 = vmatprep.subr.mxu0 %v335_v58  ;;  %598 = vmatprep.subr.mxu1 %v367_v59 }
  0x61   :  { %564 = vmatpush3.msra.mxu0 %v319_v60  ;;  %599 = vmatpush3.msra.mxu1 %v351_v61 }
  0x62   :  { %565 = vmatprep.subr.mxu0 %v334_v62  ;;  %600 = vmatprep.subr.mxu1 %v366_v63 }
  0x63   :  { %566 = vmatpush3.msra.mxu0 %v318_v0  ;;  %601 = vmatpush3.msra.mxu1 %v350_v1 }
 0x103   :  { %v238_v13 = vpop.f32.mrf.mxu0  ;;  %v309_v14 = vpop.f32.mrf.mxu1 }
 0x104   :  { %v310_v15 = vadd.f32 %v309_v14, %v163_v9  ;;  %v239_v16 = vadd.f32 %v238_v13, %v155_v10 }
 0x105   :  { %v240_v17 = vpop.f32.mrf.mxu0  ;;  %v311_v18 = vpop.f32.mrf.mxu1 }
 0x106   :  { %v241_v19 = vadd.f32 %v240_v17, %v159_v11  ;;  %v312_v20 = vadd.f32 %v311_v18, %v167_v12  ;;  %v316_v21 = vmax.f32 %v310_v15, 0.0  ;;  %v314_v24 = vmax.f32 %v239_v16, 0.0 }
 0x108   :  { %v315_v22 = vmax.f32 %v241_v19, 0.0  ;;  %v317_v23 = vmax.f32 %v312_v20, 0.0 }
 0x10a   :  { %453 = vmatprep.mubr.f32.mxu0 %v315_v22  ;;  %523 = vmatprep.mubr.f32.mxu1 %v317_v23 }
 0x10b   :  { %454 = vmatmul.mubr.f32.vlgmr.msra.gmra.mxu0 %v314_v24  ;;  %524 = vmatmul.mubr.f32.vlgmr.msra.gmra.mxu1 %v316_v21 }
 0x1cb   :  { %v567_v25 = vpop.f32.mrf.mxu0  ;;  %v602_v26 = vpop.f32.mrf.mxu1 }
 0x1cd   :  { %v568_v28 = vpop.f32.mrf.mxu0  ;;  %v603_v29 = vpop.f32.mrf.mxu1 }
 0x1ce   :  { %v569_v30 = vadd.f32 %v568_v28, %v567_v25  ;;  %v604_v32 = vadd.f32 %v603_v29, %v602_v26 }
 0x1d0   :  { %v456_v31 = vadd.f32 %v569_v30, %v534_v27 }
 0x1d2   :  { %v526_v33 = vadd.f32 %v604_v32, %v456_v31 }
 0x1d4   :  { %529 = vst [vmem:[%s1231_s5] sm:$0xff] %v526_v33 }

</bundles_post_ra>
